<compile_context>
chip_gen: v7x
topology: tpu7x:2x2x1
jax: 0.10.0
libtpu: 0.0.40
codegen_flags: <defaults>
</compile_context>

<pallas_src>
import jax
import jax.numpy as jnp
from jax.experimental import pallas as pl
from jax.experimental.pallas import tpu as pltpu

# --- packed-parameter slab layout (rows of a (SLAB_ROWS, 128) bf16 array) ----
HID = 128
IN_DIM = 4
OUT_DIM = 2
W1_OFF = 0       # rows   0..127 : w1 (4,128)  zero-padded to (128,128)
W2_OFF = 128     # rows 128..255 : w2 (128,128)
W3_OFF = 256     # rows 256..383 : w3 (128,2)  zero-padded to (128,128)
BIAS_OFF = 384   # row 384: b1, row 385: b2, row 386: b3 (zero-padded to 128)
SLAB_ROWS = 392  # 8-aligned


def qnet_kernel(x_ref, p_ref, o_ref, xs_ref):
    B, F = x_ref.shape

    # Zero-pad x into a (Bp, 128) f32 scratch inside the kernel (no wrapper pad HLO).
    xs_ref[...] = jnp.zeros_like(xs_ref)
    xs_ref[0:B, 0:F] = x_ref[...].astype(jnp.float32)
    x = xs_ref[...]                                         # (Bp, 128) f32

    # Static slices of the bf16 slab; up-cast to f32 in VMEM so the whole
    # accumulate path stays f32 (only weight storage is quantized).
    w1 = p_ref[W1_OFF:W1_OFF + HID, :].astype(jnp.float32)
    w2 = p_ref[W2_OFF:W2_OFF + HID, :].astype(jnp.float32)
    w3 = p_ref[W3_OFF:W3_OFF + HID, :].astype(jnp.float32)
    biases = p_ref[BIAS_OFF:BIAS_OFF + 8, :].astype(jnp.float32)  # one aligned 8-row load
    b1 = biases[0:1, :]
    b2 = biases[1:2, :]
    b3 = biases[2:3, :]

    h1 = jnp.dot(x, w1, preferred_element_type=jnp.float32) + b1
    h1 = jnp.maximum(h1, 0.0)                               # ReLU, (Bp, 128)
    h2 = jnp.dot(h1, w2, preferred_element_type=jnp.float32) + b2
    h2 = jnp.maximum(h2, 0.0)                               # ReLU, (Bp, 128)
    out = jnp.dot(h2, w3, preferred_element_type=jnp.float32) + b3
    o_ref[...] = out.astype(o_ref.dtype)                    # lane-dense (Bp, 128) store


def pack_params(params):
    """Pack (w1,b1,w2,b2,w3,b3) into one zero-padded (392,128) bf16 slab.

    Call this ONCE when parameters are created/updated (it is hoisted out of
    the per-forward path); pass the resulting slab to qnet_forward.
    """
    w1, b1, w2, b2, w3, b3 = params
    slab = jnp.zeros((SLAB_ROWS, HID), jnp.float32)
    slab = slab.at[W1_OFF:W1_OFF + w1.shape[0], :].set(w1)            # (4,128)
    slab = slab.at[W2_OFF:W2_OFF + HID, :].set(w2)                    # (128,128)
    slab = slab.at[W3_OFF:W3_OFF + HID, :w3.shape[1]].set(w3)         # (128,2)
    slab = slab.at[BIAS_OFF, :].set(b1[0])                            # (128,)
    slab = slab.at[BIAS_OFF + 1, :].set(b2[0])                        # (128,)
    slab = slab.at[BIAS_OFF + 2, :b3.shape[1]].set(b3[0])             # (2,)
    return slab.astype(jnp.bfloat16)


@jax.jit
def qnet_forward(x, slab):
    """Q-values for a batch of 4-dim observations; slab = pack_params(params)."""
    B, F = x.shape
    Bp = max(8, ((B + 7) // 8) * 8)                 # pad batch to 8 sublanes (in-kernel)

    flops = 2 * Bp * (HID * HID * 3)                # padded matmul flops
    bytes_accessed = slab.size * 2 + (x.size + Bp * HID) * 4
    cost = pl.CostEstimate(flops=flops, transcendentals=0,
                           bytes_accessed=bytes_accessed)

    full = lambda shape: pl.BlockSpec(shape, lambda: (0,) * len(shape))
    out = pl.pallas_call(
        qnet_kernel,
        out_shape=jax.ShapeDtypeStruct((Bp, HID), jnp.float32),
        grid=(),
        in_specs=[full(x.shape), full(slab.shape)],
        out_specs=full((Bp, HID)),
        scratch_shapes=[pltpu.VMEM((Bp, HID), jnp.float32)],
        cost_estimate=cost,
    )(x, slab)
    # valid Q-values live in the first B rows / first 2 lanes (sliced inside jit)
    return out[:B, :OUT_DIM]


def init_params(key):
    """Deterministic init mimicking nn.Linear's uniform(-1/sqrt(fan_in), ...)."""
    def linear(key, fan_in, fan_out):
        kw, kb = jax.random.split(key)
        bound = 1.0 / jnp.sqrt(fan_in)
        w = jax.random.uniform(kw, (fan_in, fan_out), jnp.float32, -bound, bound)
        b = jax.random.uniform(kb, (1, fan_out), jnp.float32, -bound, bound)
        return w, b

    k1, k2, k3 = jax.random.split(key, 3)
    w1, b1 = linear(k1, IN_DIM, HID)
    w2, b2 = linear(k2, HID, HID)
    w3, b3 = linear(k3, HID, OUT_DIM)
    return w1, b1, w2, b2, w3, b3


def qnet_reference(x, params):
    """Pure-JAX reference for correctness checking."""
    w1, b1, w2, b2, w3, b3 = params
    h1 = jnp.maximum(x @ w1 + b1, 0.0)
    h2 = jnp.maximum(h1 @ w2 + b2, 0.0)
    return h2 @ w3 + b3


def quantize_params_bf16(params):
    """Apply the same bf16 weight rounding the packed slab uses."""
    return tuple(p.astype(jnp.bfloat16).astype(jnp.float32) for p in params)


# TODO(synk): sample_action's epsilon-greedy coin flip is host-side Python RNG /
# control flow and stays outside the kernel (argmax over 2 lanes could be fused
# in-kernel for an acting policy if desired).


if __name__ == "__main__":
    key = jax.random.PRNGKey(0)
    kx, kp = jax.random.split(key)

    B = 8  # small batch of 4-dim observations (CartPole-style state)
    x = jax.random.normal(kx, (B, IN_DIM), dtype=jnp.float32)
    params = init_params(kp)

    # Pack once (hoisted out of the per-call hot path).
    slab = jax.block_until_ready(pack_params(params))

    out = qnet_forward(x, slab)
    out = jax.block_until_ready(out)
    assert out.shape == (B, OUT_DIM)

    # Tight check vs. a reference using the same bf16-rounded weights
    # (verifies kernel math exactly up to f32 accumulation order).
    ref_q = qnet_reference(x, quantize_params_bf16(params))
    assert jnp.allclose(out, ref_q, atol=1e-4, rtol=1e-4), "mismatch vs bf16-weight reference"

    # Loose check vs. the full-f32 reference (bf16 weight quantization ~1e-3 rel).
    ref_f32 = qnet_reference(x, params)
    assert jnp.allclose(out, ref_f32, atol=3e-2, rtol=3e-2), "mismatch vs f32 reference"

    print("KERNEL_OK")
</pallas_src>

<mosaic_0001>
module attributes {stable_mosaic.version = 11 : i64} {
  func.func @qnet_kernel(%arg0: memref<8x4xf32, #tpu.memory_space<vmem>>, %arg1: memref<392x128xbf16, #tpu.memory_space<vmem>>, %arg2: memref<8x128xf32, #tpu.memory_space<vmem>>, %arg3: memref<8x128xf32, #tpu.memory_space<vmem>>) attributes {dimension_semantics = [], scalar_prefetch = 0 : i64, scratch_operands = 1 : i64, tpu.core_type = #tpu.core_type<tc>} {
    %cst = arith.constant 0.000000e+00 : f32
    %0 = vector.broadcast %cst : f32 to vector<8x128xf32>
    %c0 = arith.constant 0 : index
    %c0_0 = arith.constant 0 : index
    %1 = vector.load %arg3[%c0, %c0_0] : memref<8x128xf32, #tpu.memory_space<vmem>>, vector<8x128xf32>
    tpu.vector_store %arg3[%c0, %c0_0], %0 {strides = array<i32>} : memref<8x128xf32, #tpu.memory_space<vmem>>, vector<8x128xf32>,
    %c0_1 = arith.constant 0 : index
    %c0_2 = arith.constant 0 : index
    %2 = vector.load %arg0[%c0_1, %c0_2] : memref<8x4xf32, #tpu.memory_space<vmem>>, vector<8x4xf32>
    %c0_3 = arith.constant 0 : index
    %c0_4 = arith.constant 0 : index
    %3 = vector.load %arg3[%c0_3, %c0_4] : memref<8x128xf32, #tpu.memory_space<vmem>>, vector<8x4xf32>
    tpu.vector_store %arg3[%c0_3, %c0_4], %2 {strides = array<i32>} : memref<8x128xf32, #tpu.memory_space<vmem>>, vector<8x4xf32>,
    %c0_5 = arith.constant 0 : index
    %c0_6 = arith.constant 0 : index
    %4 = vector.load %arg3[%c0_5, %c0_6] : memref<8x128xf32, #tpu.memory_space<vmem>>, vector<8x128xf32>
    %c0_7 = arith.constant 0 : index
    %c0_8 = arith.constant 0 : index
    %5 = vector.load %arg1[%c0_7, %c0_8] : memref<392x128xbf16, #tpu.memory_space<vmem>>, vector<128x128xbf16>
    %6 = arith.extf %5 : vector<128x128xbf16> to vector<128x128xf32>
    %c128 = arith.constant 128 : index
    %c0_9 = arith.constant 0 : index
    %7 = vector.load %arg1[%c128, %c0_9] : memref<392x128xbf16, #tpu.memory_space<vmem>>, vector<128x128xbf16>
    %8 = arith.extf %7 : vector<128x128xbf16> to vector<128x128xf32>
    %c256 = arith.constant 256 : index
    %c0_10 = arith.constant 0 : index
    %9 = vector.load %arg1[%c256, %c0_10] : memref<392x128xbf16, #tpu.memory_space<vmem>>, vector<128x128xbf16>
    %10 = arith.extf %9 : vector<128x128xbf16> to vector<128x128xf32>
    %c384 = arith.constant 384 : index
    %c0_11 = arith.constant 0 : index
    %11 = vector.load %arg1[%c384, %c0_11] : memref<392x128xbf16, #tpu.memory_space<vmem>>, vector<8x128xbf16>
    %12 = arith.extf %11 : vector<8x128xbf16> to vector<8x128xf32>
    %13 = vector.extract_strided_slice %12 {offsets = [0, 0], sizes = [1, 128], strides = [1, 1]} : vector<8x128xf32> to vector<1x128xf32>
    %14 = vector.extract_strided_slice %12 {offsets = [1, 0], sizes = [1, 128], strides = [1, 1]} : vector<8x128xf32> to vector<1x128xf32>
    %15 = vector.extract_strided_slice %12 {offsets = [2, 0], sizes = [1, 128], strides = [1, 1]} : vector<8x128xf32> to vector<1x128xf32>
    %cst_12 = arith.constant dense<0.000000e+00> : vector<8x128xf32>
    %16 = tpu.matmul %4, %6, %cst_12 {dimension_numbers = #tpu.dot_dimension_numbers<[1], [0], [0], [1], [0, 0, 1, 1], [], []>} : vector<8x128xf32>, vector<128x128xf32>, vector<8x128xf32> -> vector<8x128xf32>
    %17 = vector.broadcast %13 : vector<1x128xf32> to vector<8x128xf32>
    %18 = arith.addf %16, %17 : vector<8x128xf32>
    %cst_13 = arith.constant 0.000000e+00 : f32
    %19 = vector.broadcast %cst_13 : f32 to vector<8x128xf32>
    %20 = arith.maximumf %18, %19 : vector<8x128xf32>
    %cst_14 = arith.constant dense<0.000000e+00> : vector<8x128xf32>
    %21 = tpu.matmul %20, %8, %cst_14 {dimension_numbers = #tpu.dot_dimension_numbers<[1], [0], [0], [1], [0, 0, 1, 1], [], []>} : vector<8x128xf32>, vector<128x128xf32>, vector<8x128xf32> -> vector<8x128xf32>
    %22 = vector.broadcast %14 : vector<1x128xf32> to vector<8x128xf32>
    %23 = arith.addf %21, %22 : vector<8x128xf32>
    %cst_15 = arith.constant 0.000000e+00 : f32
    %24 = vector.broadcast %cst_15 : f32 to vector<8x128xf32>
    %25 = arith.maximumf %23, %24 : vector<8x128xf32>
    %cst_16 = arith.constant dense<0.000000e+00> : vector<8x128xf32>
    %26 = tpu.matmul %25, %10, %cst_16 {dimension_numbers = #tpu.dot_dimension_numbers<[1], [0], [0], [1], [0, 0, 1, 1], [], []>} : vector<8x128xf32>, vector<128x128xf32>, vector<8x128xf32> -> vector<8x128xf32>
    %27 = vector.broadcast %15 : vector<1x128xf32> to vector<8x128xf32>
    %28 = arith.addf %26, %27 : vector<8x128xf32>
    %c0_17 = arith.constant 0 : index
    %c0_18 = arith.constant 0 : index
    %29 = vector.load %arg2[%c0_17, %c0_18] : memref<8x128xf32, #tpu.memory_space<vmem>>, vector<8x128xf32>
    tpu.vector_store %arg2[%c0_17, %c0_18], %28 {strides = array<i32>} : memref<8x128xf32, #tpu.memory_space<vmem>>, vector<8x128xf32>,
    return
  }
}

</mosaic_0001>

<bundles_post_ra>
// kernel: qnet_forward.1
= control target key start
LH: loop header
LB: loop body
LE: loop exit
PB: predicated region body
PF: predicated region fallthrough
CT: control target
= control target key end

     0   :  { %7 = vsyncpa [#allocation4], 0  ;;  %s735_s9 = smov [#allocation3]   ;;  %s801_s0 = inlined_call_operand.vmem [shape: f32[8,4], index: 0, kind: input, shape index: {}]   ;;  %s802_s1 = inlined_call_operand.hbm [shape: bf16[392,128], index: 1, kind: input, shape index: {}]   ;;  %s803_s2 = inlined_call_operand.vmem [shape: f32[8,128], index: 2, kind: output, shape index: {}]  }
   0x1   :  { %s15_s10 = sshll.u32 %s735_s9, 4  ;;  %s711_s13 = scalar_lea.hbm %s802_s1, 3136  ;;  %s16_s10 = int_to_ptr.vmem [resolvable:$true] %s15_s10 }
   0x2   :  { %p712_p0 = scmp.ne.s32.totalorder %s802_s1, %s711_s13  ;;  %p715_p1 = scmp.lt.u32.totalorder %s711_s13, %s802_s1 }
   0x4   :  { %p717_p2 = pnand %p715_p1, %p712_p0 }
   0x6   :  { %720 = shalt.err (!%p717_p2)
}
   0x7   :  { %s721_s18 = scalar_lea.vmem %s16_s10, 3136  ;;  %p726_p4 = scmp.lt.s32.totalorder %s16_s10, %s16_s10 }
   0x8   :  { %p722_p3 = scmp.ne.s32.totalorder %s16_s10, %s721_s18  ;;  %p727_p5 = scmp.lt.s32.totalorder %s721_s18, %s721_s18 }
   0xa   :  { %p728_p6 = por %p727_p5, %p726_p4 }
   0xc   :  { %p729_p7 = pnand %p728_p6, %p722_p3 }
   0xe   :  { %732 = shalt.err (!%p729_p7)
}
   0xf   :  { %s736_s19 = smov 64   ;;  %s737_s20 = smov 4  }
  0x10   :  { %21 = dma.hbm_to_vmem [thread:$0]  %s802_s1, 3136, %s16_s10, [#allocation4], %s736_s19, %s736_s19, %s737_s20  }
  0x11   :  { %733 = dma.done.wait [#allocation4], 3136  }
  0x12   :  { %734 = vsyncadd [#allocation4], 4294964160  ;;  %v738_v0 = vmov 0.0|0.0   ;;  %v739_v1 = vmov 0.0   ;;  %vm740_vm0 = vmmov 0   ;;  %v359_v2 = vld [vmem:[#allocation3] sm:$0xff]   ;;  %v128_v27 = vlaneseq }
  0x13   :  { %633 = vmatprep.subr.bf16.mxu0 %v738_v0  ;;  %25 = vst [vmem:[#allocation2] sm:$0xff] %v739_v1  ;;  %560 = vmatprep.mubr.msk.f32.mxu0 %vm740_vm0, %v739_v1  ;;  %vm27_vm1 = vcmask 31744   ;;  %v454_v3 = vld [vmem:[#allocation3 + $0x8] sm:$0xff]   ;;  %v26_v4 = vld [vmem:[%s801_s0] sm:$0xff]  ;;  %v461_v5 = vld [vmem:[#allocation3 + $0x40] sm:$0xff]  }
  0x14   :  { %657 = vmatprep.subr.bf16.mxu1 %v738_v0  ;;  %595 = vmatprep.mubr.msk.f32.mxu1 %vm740_vm0, %v739_v1  ;;  %28 = vst.msk [vmem:[#allocation2] sm:$0xff] %vm27_vm1, %v26_v4  ;;  %v462_v6 = vld [vmem:[#allocation3 + $0x48] sm:$0xff]   ;;  %v455_v7 = vld [vmem:[#allocation3 + $0x10] sm:$0xff]   ;;  %v456_v9 = vld [vmem:[#allocation3 + $0x18] sm:$0xff]   ;;  %v129_v28 = vshrl.u32 %v128_v27, 7 }
  0x15   :  { %635 = vmatpush3.bf16.msra.mxu0 %v359_v2  ;;  %659 = vmatpush3.bf16.msra.mxu1 %v461_v5  ;;  %v463_v8 = vld [vmem:[#allocation3 + $0x50] sm:$0xff]   ;;  %v464_v10 = vld [vmem:[#allocation3 + $0x58] sm:$0xff]   ;;  %v457_v11 = vld [vmem:[#allocation3 + $0x20] sm:$0xff]  }
  0x16   :  { %636 = vmatprep.subr.bf16.mxu0 %v738_v0  ;;  %660 = vmatprep.subr.bf16.mxu1 %v738_v0  ;;  %v465_v12 = vld [vmem:[#allocation3 + $0x60] sm:$0xff]   ;;  %v458_v13 = vld [vmem:[#allocation3 + $0x28] sm:$0xff]   ;;  %v459_v15 = vld [vmem:[#allocation3 + $0x30] sm:$0xff]   ;;  %v130_v31 = vsub.s32 0, %v129_v28  ;;  %v205_v38 = vsub.s32 1, %v129_v28  ;;  %v280_v44 = vsub.s32 2, %v129_v28 }
  0x17   :  { %v466_v14 = vld [vmem:[#allocation3 + $0x68] sm:$0xff]   ;;  %v467_v16 = vld [vmem:[#allocation3 + $0x70] sm:$0xff]   ;;  %v460_v17 = vld [vmem:[#allocation3 + $0x38] sm:$0xff]  }
  0x18   :  { %v468_v19 = vld [vmem:[#allocation3 + $0x78] sm:$0xff]   ;;  %v469_v20 = vld [vmem:[#allocation3 + $0x80] sm:$0xff]   ;;  %v470_v21 = vld [vmem:[#allocation3 + $0x88] sm:$0xff]  }
  0x19   :  { %638 = vmatpush3.bf16.msra.mxu0 %v454_v3  ;;  %662 = vmatpush3.bf16.msra.mxu1 %v462_v6  ;;  %v471_v22 = vld [vmem:[#allocation3 + $0x90] sm:$0xff]   ;;  %v472_v23 = vld [vmem:[#allocation3 + $0x98] sm:$0xff]   ;;  %v473_v24 = vld [vmem:[#allocation3 + $0xa0] sm:$0xff]  }
  0x1a   :  { %639 = vmatprep.subr.bf16.mxu0 %v738_v0  ;;  %663 = vmatprep.subr.bf16.mxu1 %v738_v0  ;;  %v474_v25 = vld [vmem:[#allocation3 + $0xa8] sm:$0xff]   ;;  %v475_v26 = vld [vmem:[#allocation3 + $0xb0] sm:$0xff]   ;;  %v126_v29 = vld [vmem:[#allocation3 + $0xc0] sm:$0xf] }
  0x1b   :  { %v29_v18 = vld [vmem:[#allocation2] sm:$0xff]  ;;  %v127_v30 = vunpack.c.l.bf16 %v126_v29 }
  0x1c   :  { %v476_v37 = vld [vmem:[#allocation3 + $0xb8] sm:$0xff]  }
  0x1d   :  { %641 = vmatpush3.bf16.msra.mxu0 %v455_v7  ;;  %665 = vmatpush3.bf16.msra.mxu1 %v463_v8  ;;  %v131_v32 = vrot.slane %v127_v30, %v130_v31  ;;  %v206_v39 = vrot.slane %v127_v30, %v205_v38  ;;  %v281_v45 = vrot.slane %v127_v30, %v280_v44 }
  0x1e   :  { %642 = vmatprep.subr.bf16.mxu0 %v738_v0  ;;  %666 = vmatprep.subr.bf16.mxu1 %v738_v0 }
  0x21   :  { %644 = vmatpush3.bf16.msra.mxu0 %v456_v9  ;;  %668 = vmatpush3.bf16.msra.mxu1 %v464_v10 }
  0x22   :  { %645 = vmatprep.subr.bf16.mxu0 %v738_v0  ;;  %669 = vmatprep.subr.bf16.mxu1 %v738_v0 }
  0x25   :  { %647 = vmatpush3.bf16.msra.mxu0 %v457_v11  ;;  %671 = vmatpush3.bf16.msra.mxu1 %v465_v12 }
  0x26   :  { %648 = vmatprep.subr.bf16.mxu0 %v738_v0  ;;  %672 = vmatprep.subr.bf16.mxu1 %v738_v0 }
  0x29   :  { %650 = vmatpush3.bf16.msra.mxu0 %v458_v13  ;;  %674 = vmatpush3.bf16.msra.mxu1 %v466_v14 }
  0x2a   :  { %651 = vmatprep.subr.bf16.mxu0 %v738_v0  ;;  %675 = vmatprep.subr.bf16.mxu1 %v738_v0 }
  0x2d   :  { %653 = vmatpush3.bf16.msra.mxu0 %v459_v15  ;;  %677 = vmatpush3.bf16.msra.mxu1 %v467_v16 }
  0x2e   :  { %654 = vmatprep.subr.bf16.mxu0 %v738_v0  ;;  %678 = vmatprep.subr.bf16.mxu1 %v738_v0 }
  0x31   :  { %656 = vmatpush3.bf16.msra.mxu0 %v460_v17  ;;  %680 = vmatpush3.bf16.msra.mxu1 %v468_v19 }
  0x32   :  { %681 = vmatprep.subr.bf16.mxu0 %v738_v0 }
  0x34   :  { %561 = vmatmul.mubr.f32.vlgmr.msra.gmra.mrb[0].mxu0 %v29_v18 }
  0x35   :  { %630 = vmatprep.mubr.msk.f32.mxu0 %vm740_vm0, %v739_v1  ;;  %683 = vmatpush3.bf16.msra.mxu0 %v469_v20 }
  0x36   :  { %684 = vmatprep.subr.bf16.mxu0 %v738_v0 }
  0x39   :  { %686 = vmatpush3.bf16.msra.mxu0 %v470_v21 }
  0x3a   :  { %687 = vmatprep.subr.bf16.mxu0 %v738_v0 }
  0x3d   :  { %689 = vmatpush3.bf16.msra.mxu0 %v471_v22 }
  0x3e   :  { %690 = vmatprep.subr.bf16.mxu0 %v738_v0 }
  0x41   :  { %692 = vmatpush3.bf16.msra.mxu0 %v472_v23 }
  0x42   :  { %693 = vmatprep.subr.bf16.mxu0 %v738_v0 }
  0x45   :  { %695 = vmatpush3.bf16.msra.mxu0 %v473_v24 }
  0x46   :  { %696 = vmatprep.subr.bf16.mxu0 %v738_v0 }
  0x49   :  { %698 = vmatpush3.bf16.msra.mxu0 %v474_v25 }
  0x4a   :  { %699 = vmatprep.subr.bf16.mxu0 %v738_v0 }
  0x4d   :  { %701 = vmatpush3.bf16.msra.mxu0 %v475_v26 }
  0x4e   :  { %702 = vmatprep.subr.bf16.mxu0 %v738_v0 }
  0x51   :  { %704 = vmatpush3.bf16.msra.mxu0 %v476_v37 }
 0x107   :  { %v198_v33 = vpop.f32.mrb[0].mxu0 }
 0x108   :  { %v199_v34 = vadd.f32 %v198_v33, %v131_v32  ;;  %v562_v35 = vpop.f32.mrb[1].mxu0 }
 0x10a   :  { %v202_v36 = vmax.f32 %v199_v34, 0.0 }
 0x10c   :  { %596 = vmatmul.mubr.f32.vlgmr.msra.gmra.mrb[0].mxu1 %v202_v36 }
 0x1df   :  { %v273_v40 = vpop.f32.mrb[0].mxu1 }
 0x1e0   :  { %v274_v41 = vadd.f32 %v273_v40, %v206_v39  ;;  %v597_v42 = vpop.f32.mrb[1].mxu1 }
 0x1e2   :  { %v277_v43 = vmax.f32 %v274_v41, 0.0 }
 0x1e4   :  { %631 = vmatmul.mubr.f32.vlgmr.msra.gmra.mrb[2].mxu0 %v277_v43 }
 0x2b7   :  { %v348_v46 = vpop.f32.mrb[2].mxu0 }
 0x2b8   :  { %v349_v47 = vadd.f32 %v348_v46, %v281_v45  ;;  %v632_v48 = vpop.f32.mrb[3].mxu0 }
 0x2ba   :  { %352 = vst [vmem:[%s803_s2] sm:$0xff] %v349_v47 }
 0x2bb   :  { %357 = vsyncpa [#allocation4], 1 }

</bundles_post_ra>
